<compile_context>
chip_gen: v7x
topology: tpu7x:2x2x1
jax: 0.10.0
libtpu: 0.0.40
codegen_flags: <defaults>
</compile_context>

<pallas_src>
import math

import numpy as np
import jax
import jax.numpy as jnp
from jax import lax
from jax.experimental import pallas as pl
from jax.experimental.pallas import tpu as pltpu

# ----------------------------- config ---------------------------------------
B = 2            # batch
T = 8            # sequence length (== block_size)
C = 32           # n_embd (true embedding dim)
NH = 4           # n_head
HD = C // NH     # head dim (8)
CP = 128         # lane-padded embedding dim (residual stream only)
FH = 4 * C       # MLP hidden dim == 128 (already lane dense)
BT = B * T       # batch folded into sublanes (16)
KB = NH * BT     # rows of the block-diagonal K/V (64)
LN_EPS = 1e-5
SCALE = 1.0 / math.sqrt(HD)
NEG = -1e30      # additive mask value; exp() underflows to exactly 0


# ----------------------------- kernel helpers --------------------------------
def _layernorm(x_pad, gamma, beta):
    """LayerNorm over the first C lanes of (rows, CP); pad lanes of x are zero.

    Returns only the real (rows, C) slice -- that is all the matmuls need."""
    mean = jnp.sum(x_pad, axis=-1, keepdims=True) * (1.0 / C)
    msq = jnp.sum(x_pad * x_pad, axis=-1, keepdims=True) * (1.0 / C)
    inv = lax.rsqrt(msq - mean * mean + LN_EPS)
    return (x_pad[:, :C] - mean) * inv * gamma + beta


def _gelu_tanh(x):
    c = math.sqrt(2.0 / math.pi)
    return 0.5 * x * (1.0 + jnp.tanh(c * (x + 0.044715 * x * x * x)))


# ----------------------------- kernel ----------------------------------------
def block_kernel(x_ref,
                 ln1_g_ref, ln1_b_ref,
                 wqkv_ref, bqkv_ref,
                 wo_ref, bo_ref,
                 ln2_g_ref, ln2_b_ref,
                 wfc_ref, bfc_ref,
                 wmp_ref, bmp_ref,
                 hmask_ref, psum_ref, abias_ref,
                 o_ref):
    x = x_ref[...]                                             # (BT, CP), pad lanes == 0

    # ---- attention branch ----------------------------------------------------
    h = _layernorm(x, ln1_g_ref[...], ln1_b_ref[...])          # (BT, C)

    qkv = jnp.dot(h, wqkv_ref[...],
                  preferred_element_type=jnp.float32) + bqkv_ref[...]   # (BT, 3C)
    q = qkv[:, :C]
    k = qkv[:, C:2 * C]
    v = qkv[:, 2 * C:]

    # Block-diagonal K / V: replicate along sublanes via broadcast (no concat
    # copies) and keep only head h's channels in rows h*BT : (h+1)*BT.
    hm = hmask_ref[...]                                        # (KB, C) constant
    k_big = jnp.broadcast_to(k[None], (NH, BT, C)).reshape(KB, C) * hm
    v_big = jnp.broadcast_to(v[None], (NH, BT, C)).reshape(KB, C) * hm

    # scores[b*T+t, h*BT + b'*T + s] = q_{b,h,t} . k_{b',h,s}   (one MXU op)
    scores = lax.dot_general(q, k_big, (((1,), (1,)), ((), ())),
                             preferred_element_type=jnp.float32) * SCALE
    scores = scores + abias_ref[...]                           # causal + same-batch mask

    # Row-stabilized softmax; per-(batch, head) block sums via one MXU op.
    m = jnp.max(scores, axis=-1, keepdims=True)                # diagonal always valid
    e = jnp.exp(scores - m)                                    # exactly 0 where masked
    denom = jnp.dot(e, psum_ref[...],
                    preferred_element_type=jnp.float32) + 1e-30  # guard all-masked blocks
    r = pl.reciprocal(denom, approx=True)                      # EUP slot
    r = r * (2.0 - denom * r)                                  # one Newton step -> f32 accurate
    att = e * r                                                # (BT, KB)

    # Weighted values: heads land directly at their final channel offsets.
    y = jnp.dot(att, v_big, preferred_element_type=jnp.float32)            # (BT, C)
    y = jnp.dot(y, wo_ref[...], preferred_element_type=jnp.float32) + bo_ref[...]  # (BT, CP)
    x = x + y                                                  # residual 1 (pad lanes stay 0)

    # ---- MLP branch -----------------------------------------------------------
    h2 = _layernorm(x, ln2_g_ref[...], ln2_b_ref[...])         # (BT, C)
    f = jnp.dot(h2, wfc_ref[...], preferred_element_type=jnp.float32) + bfc_ref[...]  # (BT, FH)
    f = _gelu_tanh(f)
    mlp = jnp.dot(f, wmp_ref[...], preferred_element_type=jnp.float32) + bmp_ref[...]  # (BT, CP)

    o_ref[...] = x + mlp                                       # full-width (8,128) store


# ----------------------------- wrapper ---------------------------------------
def _build_masks():
    """Trace-time constants (numpy) for the block-diagonal attention."""
    r = np.arange(KB)
    c = np.arange(C)
    # row h*BT + i keeps only head h's channels
    hmask = (c[None, :] // HD == r[:, None] // BT).astype(np.float32)       # (KB, C)
    # per-(head, batch) block summation matrix (blocks are contiguous T chunks)
    psum = (r[:, None] // T == r[None, :] // T).astype(np.float32)          # (KB, KB)
    # causal + same-batch additive bias
    i = np.arange(BT)
    b_i, t_i = i // T, i % T
    b_r, s_r = (r % BT) // T, r % T
    valid = (b_i[:, None] == b_r[None, :]) & (t_i[:, None] >= s_r[None, :])
    abias = np.where(valid, 0.0, NEG).astype(np.float32)                    # (BT, KB)
    return jnp.asarray(hmask), jnp.asarray(psum), jnp.asarray(abias)


def _pad_cols(w, cols):
    return jnp.zeros((w.shape[0], cols), jnp.float32).at[:, :w.shape[1]].set(w)


@jax.jit
def block_forward(x, params):
    (ln1_g, ln1_b, w_attn, b_attn, w_aproj, b_aproj,
     ln2_g, ln2_b, w_fc, b_fc, w_mproj, b_mproj) = params

    hmask, psum, abias = _build_masks()

    # Fold batch into sublanes; lane-pad the residual stream C=32 -> 128 so the
    # output store is one unmasked (8,128)-tiled block.  Pad lanes stay zero
    # through both residual branches (projection pad columns are zero).
    xp = jnp.zeros((BT, CP), jnp.float32).at[:, :C].set(x.reshape(BT, C))

    # Only lane-pad matrices whose outputs feed the padded residual stream.
    wo_p = _pad_cols(w_aproj, CP)          # (C, CP)
    bo_p = _pad_cols(b_aproj, CP)          # (1, CP)
    wmp_p = _pad_cols(w_mproj, CP)         # (FH, CP)
    bmp_p = _pad_cols(b_mproj, CP)         # (1, CP)

    args = (xp,
            ln1_g, ln1_b,
            w_attn, b_attn,                # fused QKV weight, unpadded (C, 3C)
            wo_p, bo_p,
            ln2_g, ln2_b,
            w_fc, b_fc,                    # already (C, FH) = (32, 128), no pad
            wmp_p, bmp_p,
            hmask, psum, abias)

    # Single grid step, every operand as its full block.
    in_specs = [pl.BlockSpec(a.shape, lambda i, n=a.ndim: (0,) * n) for a in args]

    out = pl.pallas_call(
        block_kernel,
        out_shape=jax.ShapeDtypeStruct((BT, CP), jnp.float32),
        grid_spec=pltpu.PrefetchScalarGridSpec(
            num_scalar_prefetch=0,
            grid=(1,),                     # batch folded into sublanes: one step
            in_specs=in_specs,
            out_specs=pl.BlockSpec((BT, CP), lambda i: (0, 0)),
        ),
        compiler_params=pltpu.CompilerParams(
            dimension_semantics=("arbitrary",)),
    )(*args)

    return out[:, :C].reshape(B, T, C)     # drop lane padding (wrapper-side, cheap)


# --------------------- pure-JAX reference (for sanity) -----------------------
def block_reference(x, params):
    (ln1_g, ln1_b, w_attn, b_attn, w_aproj, b_aproj,
     ln2_g, ln2_b, w_fc, b_fc, w_mproj, b_mproj) = params

    def ln(v, g, b):
        mu = jnp.mean(v, -1, keepdims=True)
        var = jnp.mean((v - mu) ** 2, -1, keepdims=True)
        return (v - mu) / jnp.sqrt(var + LN_EPS) * g + b

    h = ln(x, ln1_g, ln1_b)
    qkv = h @ w_attn + b_attn
    q, k, v = jnp.split(qkv, 3, axis=-1)
    q = q.reshape(B, T, NH, HD).transpose(0, 2, 1, 3)
    k = k.reshape(B, T, NH, HD).transpose(0, 2, 1, 3)
    v = v.reshape(B, T, NH, HD).transpose(0, 2, 1, 3)
    att = (q @ jnp.swapaxes(k, -2, -1)) / math.sqrt(HD)
    mask = jnp.tril(jnp.ones((T, T), bool))
    att = jnp.where(mask, att, -jnp.inf)
    att = jax.nn.softmax(att, axis=-1)
    y = (att @ v).transpose(0, 2, 1, 3).reshape(B, T, C)
    x = x + (y @ w_aproj + b_aproj)

    h2 = ln(x, ln2_g, ln2_b)
    f = h2 @ w_fc + b_fc
    c = math.sqrt(2.0 / math.pi)
    f = 0.5 * f * (1.0 + jnp.tanh(c * (f + 0.044715 * f ** 3)))
    x = x + (f @ w_mproj + b_mproj)
    return x


# ----------------------------- main -------------------------------------------
def init_params(key):
    ks = jax.random.split(key, 4)

    def lin(k, fan_in, fan_out):
        # torch.nn.Linear default: U(-1/sqrt(fan_in), 1/sqrt(fan_in))
        bound = 1.0 / math.sqrt(fan_in)
        kw, kb = jax.random.split(k)
        w = jax.random.uniform(kw, (fan_in, fan_out), jnp.float32, -bound, bound)
        b = jax.random.uniform(kb, (1, fan_out), jnp.float32, -bound, bound)
        return w, b

    ln1_g = jnp.ones((1, C), jnp.float32)
    ln1_b = jnp.zeros((1, C), jnp.float32)
    ln2_g = jnp.ones((1, C), jnp.float32)
    ln2_b = jnp.zeros((1, C), jnp.float32)
    w_attn, b_attn = lin(ks[0], C, 3 * C)
    w_aproj, b_aproj = lin(ks[1], C, C)
    w_fc, b_fc = lin(ks[2], C, 4 * C)
    w_mproj, b_mproj = lin(ks[3], 4 * C, C)
    return (ln1_g, ln1_b, w_attn, b_attn, w_aproj, b_aproj,
            ln2_g, ln2_b, w_fc, b_fc, w_mproj, b_mproj)


if __name__ == "__main__":
    key = jax.random.PRNGKey(0)
    kx, kp = jax.random.split(key)
    x = jax.random.normal(kx, (B, T, C), jnp.float32)
    params = init_params(kp)

    out = block_forward(x, params)
    jax.block_until_ready(out)

    ref = block_reference(x, params)
    err = float(jnp.max(jnp.abs(out - ref)))
    assert out.shape == (B, T, C)
    assert jnp.allclose(out, ref, atol=1e-3, rtol=1e-3), f"mismatch vs reference (max err {err})"

    print("KERNEL_OK")
</pallas_src>

<mosaic_0001>
module attributes {stable_mosaic.version = 11 : i64} {
  func.func @block_kernel(%arg0: i32, %arg1: memref<16x128xf32, #tpu.memory_space<vmem>>, %arg2: memref<1x32xf32, #tpu.memory_space<vmem>>, %arg3: memref<1x32xf32, #tpu.memory_space<vmem>>, %arg4: memref<32x96xf32, #tpu.memory_space<vmem>>, %arg5: memref<1x96xf32, #tpu.memory_space<vmem>>, %arg6: memref<32x128xf32, #tpu.memory_space<vmem>>, %arg7: memref<1x128xf32, #tpu.memory_space<vmem>>, %arg8: memref<1x32xf32, #tpu.memory_space<vmem>>, %arg9: memref<1x32xf32, #tpu.memory_space<vmem>>, %arg10: memref<32x128xf32, #tpu.memory_space<vmem>>, %arg11: memref<1x128xf32, #tpu.memory_space<vmem>>, %arg12: memref<128x128xf32, #tpu.memory_space<vmem>>, %arg13: memref<1x128xf32, #tpu.memory_space<vmem>>, %arg14: memref<64x32xf32, #tpu.memory_space<vmem>>, %arg15: memref<64x64xf32, #tpu.memory_space<vmem>>, %arg16: memref<16x64xf32, #tpu.memory_space<vmem>>, %arg17: memref<16x128xf32, #tpu.memory_space<vmem>>) attributes {dimension_semantics = [#tpu.dimension_semantics<arbitrary>], iteration_bounds = array<i64: 1>, scalar_prefetch = 0 : i64, scratch_operands = 0 : i64, tpu.core_type = #tpu.core_type<tc>, window_params = [{pipeline_mode = #tpu.pipeline_mode<synchronous>, transform_indices = @transform_0, window_bounds = array<i64: 16, 128>}, {pipeline_mode = #tpu.pipeline_mode<synchronous>, transform_indices = @transform_1, window_bounds = array<i64: 1, 32>}, {pipeline_mode = #tpu.pipeline_mode<synchronous>, transform_indices = @transform_2, window_bounds = array<i64: 1, 32>}, {pipeline_mode = #tpu.pipeline_mode<synchronous>, transform_indices = @transform_3, window_bounds = array<i64: 32, 96>}, {pipeline_mode = #tpu.pipeline_mode<synchronous>, transform_indices = @transform_4, window_bounds = array<i64: 1, 96>}, {pipeline_mode = #tpu.pipeline_mode<synchronous>, transform_indices = @transform_5, window_bounds = array<i64: 32, 128>}, {pipeline_mode = #tpu.pipeline_mode<synchronous>, transform_indices = @transform_6, window_bounds = array<i64: 1, 128>}, {pipeline_mode = #tpu.pipeline_mode<synchronous>, transform_indices = @transform_7, window_bounds = array<i64: 1, 32>}, {pipeline_mode = #tpu.pipeline_mode<synchronous>, transform_indices = @transform_8, window_bounds = array<i64: 1, 32>}, {pipeline_mode = #tpu.pipeline_mode<synchronous>, transform_indices = @transform_9, window_bounds = array<i64: 32, 128>}, {pipeline_mode = #tpu.pipeline_mode<synchronous>, transform_indices = @transform_10, window_bounds = array<i64: 1, 128>}, {pipeline_mode = #tpu.pipeline_mode<synchronous>, transform_indices = @transform_11, window_bounds = array<i64: 128, 128>}, {pipeline_mode = #tpu.pipeline_mode<synchronous>, transform_indices = @transform_12, window_bounds = array<i64: 1, 128>}, {pipeline_mode = #tpu.pipeline_mode<synchronous>, transform_indices = @transform_13, window_bounds = array<i64: 64, 32>}, {pipeline_mode = #tpu.pipeline_mode<synchronous>, transform_indices = @transform_14, window_bounds = array<i64: 64, 64>}, {pipeline_mode = #tpu.pipeline_mode<synchronous>, transform_indices = @transform_15, window_bounds = array<i64: 16, 64>}, {pipeline_mode = #tpu.pipeline_mode<synchronous>, transform_indices = @transform_16, window_bounds = array<i64: 16, 128>}]} {
    %c0 = arith.constant 0 : index
    %c0_0 = arith.constant 0 : index
    %0 = vector.load %arg1[%c0, %c0_0] : memref<16x128xf32, #tpu.memory_space<vmem>>, vector<16x128xf32>
    %c0_1 = arith.constant 0 : index
    %c0_2 = arith.constant 0 : index
    %1 = vector.load %arg2[%c0_1, %c0_2] : memref<1x32xf32, #tpu.memory_space<vmem>>, vector<1x32xf32>
    %c0_3 = arith.constant 0 : index
    %c0_4 = arith.constant 0 : index
    %2 = vector.load %arg3[%c0_3, %c0_4] : memref<1x32xf32, #tpu.memory_space<vmem>>, vector<1x32xf32>
    %cst = arith.constant dense<0.000000e+00> : vector<16xf32>
    %3 = vector.multi_reduction <add>, %0, %cst [1] : vector<16x128xf32> to vector<16xf32>
    %4 = vector.shape_cast %3 : vector<16xf32> to vector<16x1xf32>
    %cst_5 = arith.constant 3.125000e-02 : f32
    %5 = vector.broadcast %cst_5 : f32 to vector<16x1xf32>
    %6 = arith.mulf %4, %5 : vector<16x1xf32>
    %7 = arith.mulf %0, %0 : vector<16x128xf32>
    %cst_6 = arith.constant dense<0.000000e+00> : vector<16xf32>
    %8 = vector.multi_reduction <add>, %7, %cst_6 [1] : vector<16x128xf32> to vector<16xf32>
    %9 = vector.shape_cast %8 : vector<16xf32> to vector<16x1xf32>
    %cst_7 = arith.constant 3.125000e-02 : f32
    %10 = vector.broadcast %cst_7 : f32 to vector<16x1xf32>
    %11 = arith.mulf %9, %10 : vector<16x1xf32>
    %12 = arith.mulf %6, %6 : vector<16x1xf32>
    %13 = arith.subf %11, %12 : vector<16x1xf32>
    %cst_8 = arith.constant 9.99999974E-6 : f32
    %14 = vector.broadcast %cst_8 : f32 to vector<16x1xf32>
    %15 = arith.addf %13, %14 : vector<16x1xf32>
    %16 = math.rsqrt %15 : vector<16x1xf32>
    %17 = vector.extract_strided_slice %0 {offsets = [0, 0], sizes = [16, 32], strides = [1, 1]} : vector<16x128xf32> to vector<16x32xf32>
    %18 = vector.broadcast %6 : vector<16x1xf32> to vector<16x32xf32>
    %19 = arith.subf %17, %18 : vector<16x32xf32>
    %20 = vector.broadcast %16 : vector<16x1xf32> to vector<16x32xf32>
    %21 = arith.mulf %19, %20 : vector<16x32xf32>
    %22 = vector.broadcast %1 : vector<1x32xf32> to vector<16x32xf32>
    %23 = arith.mulf %21, %22 : vector<16x32xf32>
    %24 = vector.broadcast %2 : vector<1x32xf32> to vector<16x32xf32>
    %25 = arith.addf %23, %24 : vector<16x32xf32>
    %c0_9 = arith.constant 0 : index
    %c0_10 = arith.constant 0 : index
    %26 = vector.load %arg4[%c0_9, %c0_10] : memref<32x96xf32, #tpu.memory_space<vmem>>, vector<32x96xf32>
    %cst_11 = arith.constant dense<0.000000e+00> : vector<16x96xf32>
    %27 = tpu.matmul %25, %26, %cst_11 {dimension_numbers = #tpu.dot_dimension_numbers<[1], [0], [0], [1], [0, 0, 1, 1], [], []>} : vector<16x32xf32>, vector<32x96xf32>, vector<16x96xf32> -> vector<16x96xf32>
    %c0_12 = arith.constant 0 : index
    %c0_13 = arith.constant 0 : index
    %28 = vector.load %arg5[%c0_12, %c0_13] : memref<1x96xf32, #tpu.memory_space<vmem>>, vector<1x96xf32>
    %29 = vector.broadcast %28 : vector<1x96xf32> to vector<16x96xf32>
    %30 = arith.addf %27, %29 : vector<16x96xf32>
    %31 = vector.extract_strided_slice %30 {offsets = [0, 0], sizes = [16, 32], strides = [1, 1]} : vector<16x96xf32> to vector<16x32xf32>
    %32 = vector.extract_strided_slice %30 {offsets = [0, 32], sizes = [16, 32], strides = [1, 1]} : vector<16x96xf32> to vector<16x32xf32>
    %33 = vector.extract_strided_slice %30 {offsets = [0, 64], sizes = [16, 32], strides = [1, 1]} : vector<16x96xf32> to vector<16x32xf32>
    %c0_14 = arith.constant 0 : index
    %c0_15 = arith.constant 0 : index
    %34 = vector.load %arg14[%c0_14, %c0_15] : memref<64x32xf32, #tpu.memory_space<vmem>>, vector<64x32xf32>
    %35 = vector.shape_cast %32 : vector<16x32xf32> to vector<1x16x32xf32>
    %36 = vector.shape_cast %35 : vector<1x16x32xf32> to vector<1x16x32xf32>
    %37 = vector.broadcast %36 : vector<1x16x32xf32> to vector<4x16x32xf32>
    %38 = vector.shape_cast %37 : vector<4x16x32xf32> to vector<64x32xf32>
    %39 = arith.mulf %38, %34 : vector<64x32xf32>
    %40 = vector.shape_cast %33 : vector<16x32xf32> to vector<1x16x32xf32>
    %41 = vector.shape_cast %40 : vector<1x16x32xf32> to vector<1x16x32xf32>
    %42 = vector.broadcast %41 : vector<1x16x32xf32> to vector<4x16x32xf32>
    %43 = vector.shape_cast %42 : vector<4x16x32xf32> to vector<64x32xf32>
    %44 = arith.mulf %43, %34 : vector<64x32xf32>
    %cst_16 = arith.constant dense<0.000000e+00> : vector<16x64xf32>
    %45 = tpu.matmul %31, %39, %cst_16 {dimension_numbers = #tpu.dot_dimension_numbers<[1], [1], [0], [0], [0, 0, 1, 0], [], []>} : vector<16x32xf32>, vector<64x32xf32>, vector<16x64xf32> -> vector<16x64xf32>
    %cst_17 = arith.constant 0.353553385 : f32
    %46 = vector.broadcast %cst_17 : f32 to vector<16x64xf32>
    %47 = arith.mulf %45, %46 : vector<16x64xf32>
    %c0_18 = arith.constant 0 : index
    %c0_19 = arith.constant 0 : index
    %48 = vector.load %arg16[%c0_18, %c0_19] : memref<16x64xf32, #tpu.memory_space<vmem>>, vector<16x64xf32>
    %49 = arith.addf %47, %48 : vector<16x64xf32>
    %cst_20 = arith.constant dense<0xFF800000> : vector<16xf32>
    %50 = vector.multi_reduction <maximumf>, %49, %cst_20 [1] : vector<16x64xf32> to vector<16xf32>
    %51 = vector.shape_cast %50 : vector<16xf32> to vector<16x1xf32>
    %52 = vector.broadcast %51 : vector<16x1xf32> to vector<16x64xf32>
    %53 = arith.subf %49, %52 : vector<16x64xf32>
    %54 = math.exp %53 : vector<16x64xf32>
    %c0_21 = arith.constant 0 : index
    %c0_22 = arith.constant 0 : index
    %55 = vector.load %arg15[%c0_21, %c0_22] : memref<64x64xf32, #tpu.memory_space<vmem>>, vector<64x64xf32>
    %cst_23 = arith.constant dense<0.000000e+00> : vector<16x64xf32>
    %56 = tpu.matmul %54, %55, %cst_23 {dimension_numbers = #tpu.dot_dimension_numbers<[1], [0], [0], [1], [0, 0, 1, 1], [], []>} : vector<16x64xf32>, vector<64x64xf32>, vector<16x64xf32> -> vector<16x64xf32>
    %cst_24 = arith.constant 1.000000e-30 : f32
    %57 = vector.broadcast %cst_24 : f32 to vector<16x64xf32>
    %58 = arith.addf %56, %57 : vector<16x64xf32>
    %59 = tpu.reciprocal %58 {approx = true} : vector<16x64xf32> -> vector<16x64xf32>
    %60 = arith.mulf %58, %59 : vector<16x64xf32>
    %cst_25 = arith.constant 2.000000e+00 : f32
    %61 = vector.broadcast %cst_25 : f32 to vector<16x64xf32>
    %62 = arith.subf %61, %60 : vector<16x64xf32>
    %63 = arith.mulf %59, %62 : vector<16x64xf32>
    %64 = arith.mulf %54, %63 : vector<16x64xf32>
    %cst_26 = arith.constant dense<0.000000e+00> : vector<16x32xf32>
    %65 = tpu.matmul %64, %44, %cst_26 {dimension_numbers = #tpu.dot_dimension_numbers<[1], [0], [0], [1], [0, 0, 1, 1], [], []>} : vector<16x64xf32>, vector<64x32xf32>, vector<16x32xf32> -> vector<16x32xf32>
    %c0_27 = arith.constant 0 : index
    %c0_28 = arith.constant 0 : index
    %66 = vector.load %arg6[%c0_27, %c0_28] : memref<32x128xf32, #tpu.memory_space<vmem>>, vector<32x128xf32>
    %cst_29 = arith.constant dense<0.000000e+00> : vector<16x128xf32>
    %67 = tpu.matmul %65, %66, %cst_29 {dimension_numbers = #tpu.dot_dimension_numbers<[1], [0], [0], [1], [0, 0, 1, 1], [], []>} : vector<16x32xf32>, vector<32x128xf32>, vector<16x128xf32> -> vector<16x128xf32>
    %c0_30 = arith.constant 0 : index
    %c0_31 = arith.constant 0 : index
    %68 = vector.load %arg7[%c0_30, %c0_31] : memref<1x128xf32, #tpu.memory_space<vmem>>, vector<1x128xf32>
    %69 = vector.broadcast %68 : vector<1x128xf32> to vector<16x128xf32>
    %70 = arith.addf %67, %69 : vector<16x128xf32>
    %71 = arith.addf %0, %70 : vector<16x128xf32>
    %c0_32 = arith.constant 0 : index
    %c0_33 = arith.constant 0 : index
    %72 = vector.load %arg8[%c0_32, %c0_33] : memref<1x32xf32, #tpu.memory_space<vmem>>, vector<1x32xf32>
    %c0_34 = arith.constant 0 : index
    %c0_35 = arith.constant 0 : index
    %73 = vector.load %arg9[%c0_34, %c0_35] : memref<1x32xf32, #tpu.memory_space<vmem>>, vector<1x32xf32>
    %cst_36 = arith.constant dense<0.000000e+00> : vector<16xf32>
    %74 = vector.multi_reduction <add>, %71, %cst_36 [1] : vector<16x128xf32> to vector<16xf32>
    %75 = vector.shape_cast %74 : vector<16xf32> to vector<16x1xf32>
    %cst_37 = arith.constant 3.125000e-02 : f32
    %76 = vector.broadcast %cst_37 : f32 to vector<16x1xf32>
    %77 = arith.mulf %75, %76 : vector<16x1xf32>
    %78 = arith.mulf %71, %71 : vector<16x128xf32>
    %cst_38 = arith.constant dense<0.000000e+00> : vector<16xf32>
    %79 = vector.multi_reduction <add>, %78, %cst_38 [1] : vector<16x128xf32> to vector<16xf32>
    %80 = vector.shape_cast %79 : vector<16xf32> to vector<16x1xf32>
    %cst_39 = arith.constant 3.125000e-02 : f32
    %81 = vector.broadcast %cst_39 : f32 to vector<16x1xf32>
    %82 = arith.mulf %80, %81 : vector<16x1xf32>
    %83 = arith.mulf %77, %77 : vector<16x1xf32>
    %84 = arith.subf %82, %83 : vector<16x1xf32>
    %cst_40 = arith.constant 9.99999974E-6 : f32
    %85 = vector.broadcast %cst_40 : f32 to vector<16x1xf32>
    %86 = arith.addf %84, %85 : vector<16x1xf32>
    %87 = math.rsqrt %86 : vector<16x1xf32>
    %88 = vector.extract_strided_slice %71 {offsets = [0, 0], sizes = [16, 32], strides = [1, 1]} : vector<16x128xf32> to vector<16x32xf32>
    %89 = vector.broadcast %77 : vector<16x1xf32> to vector<16x32xf32>
    %90 = arith.subf %88, %89 : vector<16x32xf32>
    %91 = vector.broadcast %87 : vector<16x1xf32> to vector<16x32xf32>
    %92 = arith.mulf %90, %91 : vector<16x32xf32>
    %93 = vector.broadcast %72 : vector<1x32xf32> to vector<16x32xf32>
    %94 = arith.mulf %92, %93 : vector<16x32xf32>
    %95 = vector.broadcast %73 : vector<1x32xf32> to vector<16x32xf32>
    %96 = arith.addf %94, %95 : vector<16x32xf32>
    %c0_41 = arith.constant 0 : index
    %c0_42 = arith.constant 0 : index
    %97 = vector.load %arg10[%c0_41, %c0_42] : memref<32x128xf32, #tpu.memory_space<vmem>>, vector<32x128xf32>
    %cst_43 = arith.constant dense<0.000000e+00> : vector<16x128xf32>
    %98 = tpu.matmul %96, %97, %cst_43 {dimension_numbers = #tpu.dot_dimension_numbers<[1], [0], [0], [1], [0, 0, 1, 1], [], []>} : vector<16x32xf32>, vector<32x128xf32>, vector<16x128xf32> -> vector<16x128xf32>
    %c0_44 = arith.constant 0 : index
    %c0_45 = arith.constant 0 : index
    %99 = vector.load %arg11[%c0_44, %c0_45] : memref<1x128xf32, #tpu.memory_space<vmem>>, vector<1x128xf32>
    %100 = vector.broadcast %99 : vector<1x128xf32> to vector<16x128xf32>
    %101 = arith.addf %98, %100 : vector<16x128xf32>
    %cst_46 = arith.constant 5.000000e-01 : f32
    %102 = vector.broadcast %cst_46 : f32 to vector<16x128xf32>
    %103 = arith.mulf %102, %101 : vector<16x128xf32>
    %cst_47 = arith.constant 4.471500e-02 : f32
    %104 = vector.broadcast %cst_47 : f32 to vector<16x128xf32>
    %105 = arith.mulf %104, %101 : vector<16x128xf32>
    %106 = arith.mulf %105, %101 : vector<16x128xf32>
    %107 = arith.mulf %106, %101 : vector<16x128xf32>
    %108 = arith.addf %101, %107 : vector<16x128xf32>
    %cst_48 = arith.constant 0.797884583 : f32
    %109 = vector.broadcast %cst_48 : f32 to vector<16x128xf32>
    %110 = arith.mulf %109, %108 : vector<16x128xf32>
    %111 = math.tanh %110 : vector<16x128xf32>
    %cst_49 = arith.constant 1.000000e+00 : f32
    %112 = vector.broadcast %cst_49 : f32 to vector<16x128xf32>
    %113 = arith.addf %112, %111 : vector<16x128xf32>
    %114 = arith.mulf %103, %113 : vector<16x128xf32>
    %c0_50 = arith.constant 0 : index
    %c0_51 = arith.constant 0 : index
    %115 = vector.load %arg12[%c0_50, %c0_51] : memref<128x128xf32, #tpu.memory_space<vmem>>, vector<128x128xf32>
    %cst_52 = arith.constant dense<0.000000e+00> : vector<16x128xf32>
    %116 = tpu.matmul %114, %115, %cst_52 {dimension_numbers = #tpu.dot_dimension_numbers<[1], [0], [0], [1], [0, 0, 1, 1], [], []>} : vector<16x128xf32>, vector<128x128xf32>, vector<16x128xf32> -> vector<16x128xf32>
    %c0_53 = arith.constant 0 : index
    %c0_54 = arith.constant 0 : index
    %117 = vector.load %arg13[%c0_53, %c0_54] : memref<1x128xf32, #tpu.memory_space<vmem>>, vector<1x128xf32>
    %118 = vector.broadcast %117 : vector<1x128xf32> to vector<16x128xf32>
    %119 = arith.addf %116, %118 : vector<16x128xf32>
    %120 = arith.addf %71, %119 : vector<16x128xf32>
    %c0_55 = arith.constant 0 : index
    %c0_56 = arith.constant 0 : index
    %121 = vector.load %arg17[%c0_55, %c0_56] : memref<16x128xf32, #tpu.memory_space<vmem>>, vector<16x128xf32>
    tpu.vector_store %arg17[%c0_55, %c0_56], %120 {strides = array<i32>} : memref<16x128xf32, #tpu.memory_space<vmem>>, vector<16x128xf32>,
    return
  }
  func.func @transform_0(%arg0: i32) -> (i32, i32) {
    %c0_i32 = arith.constant 0 : i32
    %c0_i32_0 = arith.constant 0 : i32
    %c0_i32_1 = arith.constant 0 : i32
    return %c0_i32, %c0_i32_0 : i32, i32
  }
  func.func @transform_1(%arg0: i32) -> (i32, i32) {
    %c0_i32 = arith.constant 0 : i32
    %c0_i32_0 = arith.constant 0 : i32
    %c0_i32_1 = arith.constant 0 : i32
    return %c0_i32, %c0_i32_0 : i32, i32
  }
  func.func @transform_2(%arg0: i32) -> (i32, i32) {
    %c0_i32 = arith.constant 0 : i32
    %c0_i32_0 = arith.constant 0 : i32
    %c0_i32_1 = arith.constant 0 : i32
    return %c0_i32, %c0_i32_0 : i32, i32
  }
  func.func @transform_3(%arg0: i32) -> (i32, i32) {
    %c0_i32 = arith.constant 0 : i32
    %c0_i32_0 = arith.constant 0 : i32
    %c0_i32_1 = arith.constant 0 : i32
    return %c0_i32, %c0_i32_0 : i32, i32
  }
  func.func @transform_4(%arg0: i32) -> (i32, i32) {
    %c0_i32 = arith.constant 0 : i32
    %c0_i32_0 = arith.constant 0 : i32
    %c0_i32_1 = arith.constant 0 : i32
    return %c0_i32, %c0_i32_0 : i32, i32
  }
  func.func @transform_5(%arg0: i32) -> (i32, i32) {
    %c0_i32 = arith.constant 0 : i32
    %c0_i32_0 = arith.constant 0 : i32
    %c0_i32_1 = arith.constant 0 : i32
    return %c0_i32, %c0_i32_0 : i32, i32
  }
  func.func @transform_6(%arg0: i32) -> (i32, i32) {
    %c0_i32 = arith.constant 0 : i32
    %c0_i32_0 = arith.constant 0 : i32
    %c0_i32_1 = arith.constant 0 : i32
    return %c0_i32, %c0_i32_0 : i32, i32
  }
  func.func @transform_7(%arg0: i32) -> (i32, i32) {
    %c0_i32 = arith.constant 0 : i32
    %c0_i32_0 = arith.constant 0 : i32
    %c0_i32_1 = arith.constant 0 : i32
    return %c0_i32, %c0_i32_0 : i32, i32
  }
  func.func @transform_8(%arg0: i32) -> (i32, i32) {
    %c0_i32 = arith.constant 0 : i32
    %c0_i32_0 = arith.constant 0 : i32
    %c0_i32_1 = arith.constant 0 : i32
    return %c0_i32, %c0_i32_0 : i32, i32
  }
  func.func @transform_9(%arg0: i32) -> (i32, i32) {
    %c0_i32 = arith.constant 0 : i32
    %c0_i32_0 = arith.constant 0 : i32
    %c0_i32_1 = arith.constant 0 : i32
    return %c0_i32, %c0_i32_0 : i32, i32
  }
  func.func @transform_10(%arg0: i32) -> (i32, i32) {
    %c0_i32 = arith.constant 0 : i32
    %c0_i32_0 = arith.constant 0 : i32
    %c0_i32_1 = arith.constant 0 : i32
    return %c0_i32, %c0_i32_0 : i32, i32
  }
  func.func @transform_11(%arg0: i32) -> (i32, i32) {
    %c0_i32 = arith.constant 0 : i32
    %c0_i32_0 = arith.constant 0 : i32
    %c0_i32_1 = arith.constant 0 : i32
    return %c0_i32, %c0_i32_0 : i32, i32
  }
  func.func @transform_12(%arg0: i32) -> (i32, i32) {
    %c0_i32 = arith.constant 0 : i32
    %c0_i32_0 = arith.constant 0 : i32
    %c0_i32_1 = arith.constant 0 : i32
    return %c0_i32, %c0_i32_0 : i32, i32
  }
  func.func @transform_13(%arg0: i32) -> (i32, i32) {
    %c0_i32 = arith.constant 0 : i32
    %c0_i32_0 = arith.constant 0 : i32
    %c0_i32_1 = arith.constant 0 : i32
    return %c0_i32, %c0_i32_0 : i32, i32
  }
  func.func @transform_14(%arg0: i32) -> (i32, i32) {
    %c0_i32 = arith.constant 0 : i32
    %c0_i32_0 = arith.constant 0 : i32
    %c0_i32_1 = arith.constant 0 : i32
    return %c0_i32, %c0_i32_0 : i32, i32
  }
  func.func @transform_15(%arg0: i32) -> (i32, i32) {
    %c0_i32 = arith.constant 0 : i32
    %c0_i32_0 = arith.constant 0 : i32
    %c0_i32_1 = arith.constant 0 : i32
    return %c0_i32, %c0_i32_0 : i32, i32
  }
  func.func @transform_16(%arg0: i32) -> (i32, i32) {
    %c0_i32 = arith.constant 0 : i32
    %c0_i32_0 = arith.constant 0 : i32
    %c0_i32_1 = arith.constant 0 : i32
    return %c0_i32, %c0_i32_0 : i32, i32
  }
}

</mosaic_0001>

<bundles_post_ra>
// kernel: block_forward.1
= control target key start
LH: loop header
LB: loop body
LE: loop exit
PB: predicated region body
PF: predicated region fallthrough
CT: control target
= control target key end

     0   :  { %s1372_s21 = smov 32   ;;  %vm110_vm0 = vcmask 261120   ;;  %vm399_vm2 = vcmask 523264   ;;  %s1374_s18 = smov 64   ;;  %s1764_s0 = inlined_call_operand.vmem [shape: f32[16,128], index: 0, kind: input, shape index: {}]   ;;  %s1765_s3 = inlined_call_operand.vmem [shape: f32[32,96], index: 3, kind: input, shape index: {}]   ;;  %s1766_s13 = inlined_call_operand.vmem [shape: f32[64,32], index: 13, kind: input, shape index: {}]   ;;  %s1767_s1 = inlined_call_operand.vmem [shape: f32[1,32], index: 1, kind: input, shape index: {}]   ;;  %s1768_s2 = inlined_call_operand.vmem [shape: f32[1,32], index: 2, kind: input, shape index: {}]   ;;  %s1769_s4 = inlined_call_operand.vmem [shape: f32[1,96], index: 4, kind: input, shape index: {}]   ;;  %s1770_s15 = inlined_call_operand.vmem [shape: f32[16,64], index: 15, kind: input, shape index: {}]   ;;  %s1771_s14 = inlined_call_operand.vmem [shape: f32[64,64], index: 14, kind: input, shape index: {}]   ;;  %s1772_s5 = inlined_call_operand.vmem [shape: f32[32,128], index: 5, kind: input, shape index: {}]   ;;  %s1773_s6 = inlined_call_operand.vmem [shape: f32[1,128], index: 6, kind: input, shape index: {}]   ;;  %s1774_s9 = inlined_call_operand.vmem [shape: f32[32,128], index: 9, kind: input, shape index: {}]   ;;  %s1775_s11 = inlined_call_operand.vmem [shape: f32[128,128], index: 11, kind: input, shape index: {}]   ;;  %s1776_s7 = inlined_call_operand.vmem [shape: f32[1,32], index: 7, kind: input, shape index: {}]   ;;  %s1777_s8 = inlined_call_operand.vmem [shape: f32[1,32], index: 8, kind: input, shape index: {}]   ;;  %s1778_s10 = inlined_call_operand.vmem [shape: f32[1,128], index: 10, kind: input, shape index: {}]   ;;  %s1779_s12 = inlined_call_operand.vmem [shape: f32[1,128], index: 12, kind: input, shape index: {}]   ;;  %s1780_s16 = inlined_call_operand.vmem [shape: f32[16,128], index: 16, kind: output, shape index: {}]  }
   0x1   :  { %1782 = sst [smem:[#allocation2_spill]] %s1764_s0  ;;  %v99_v4 = vld [vmem:[%s1765_s3] sm:$0xff]  ;;  %v100_v5 = vld [vmem:[%s1765_s3 + $0x8] sm:$0xff]  ;;  %v101_v6 = vld [vmem:[%s1765_s3 + $0x10] sm:$0xff] }
   0x2   :  { %s1783_s23 = sld [smem:[#allocation2_spill]]  ;;  %v1197_v7 = vpack.c.bf16 %v100_v5, %v99_v4  ;;  %v102_v8 = vld [vmem:[%s1765_s3 + $0x18] sm:$0xff]  ;;  %v1491_v10 = vld [vmem:[%s1766_s13 + $0x8] sm:$0xff]  ;;  %v1497_v11 = vld [vmem:[%s1766_s13] sm:$0xff] }
   0x3   :  { %v1201_v9 = vpack.c.bf16 %v102_v8, %v101_v6  ;;  %v1502_v12 = vld [vmem:[%s1766_s13 + $0x10] sm:$0xff]  ;;  %v1508_v13 = vld [vmem:[%s1766_s13 + $0x20] sm:$0xff]  ;;  %v1514_v14 = vld [vmem:[%s1766_s13 + $0x18] sm:$0xff] }
   0x4   :  { %1198 = vmatprep.subr.bf16.mxu0 %v1197_v7  ;;  %v1520_v15 = vld [vmem:[%s1766_s13 + $0x30] sm:$0xff]  ;;  %v1526_v16 = vld [vmem:[%s1766_s13 + $0x28] sm:$0xff]  ;;  %v1533_v17 = vld [vmem:[%s1766_s13 + $0x38] sm:$0xff] }
   0x5   :  { %1200 = vmatpush3.bf16.msra.mxu0 %v1197_v7  ;;  %v978_v34 = vld [vmem:[%s1767_s1] ss:$0 sm:$0xff]  ;;  %vm1565_vm1 = vmpackc.low %vm110_vm0, %vm110_vm0 }
   0x6   :  { %1202 = vmatprep.subr.bf16.mxu0 %v1201_v9  ;;  %v979_v36 = vld [vmem:[%s1768_s2] ss:$0 sm:$0xff] }
   0x7   :  { %v980_v50 = vld [vmem:[%s1769_s4] ss:$0 sm:$0xff]  ;;  %s1373_s4 = smov 96  }
   0x8   :  { %v1463_v0 = vld [vmem:[%s1783_s23] sm:$0xff]  ;;  %v1468_v1 = vld [vmem:[%s1783_s23 + $0x8] sm:$0xff] }
   0x9   :  { %57 = vadd.xlane.f32.xlu0 %v1463_v0  ;;  %v63_v2 = vmul.f32 %v1463_v0, %v1463_v0  ;;  %v64_v3 = vmul.f32 %v1468_v1, %v1468_v1  ;;  %1204 = vmatpush3.bf16.msra.mxu0 %v1201_v9 }
   0xb   :  { %65 = vadd.xlane.f32.xlu1 %v63_v2 }
   0xd   :  { %59 = vadd.xlane.f32.xlu0 %v1468_v1 }
   0xf   :  { %67 = vadd.xlane.f32.xlu1 %v64_v3 }
  0x20   :  { %210 = vrot.lane.b32.xlu1 %v1491_v10, %s1372_s21 }
  0x23   :  { %208 = vrot.lane.b32.xlu0 %v1497_v11, %s1372_s21 }
  0x24   :  { %212 = vrot.lane.b32.xlu1 %v1502_v12, %s1372_s21 }
  0x27   :  { %216 = vrot.lane.b32.xlu0 %v1508_v13, %s1372_s21 }
  0x28   :  { %214 = vrot.lane.b32.xlu1 %v1514_v14, %s1372_s21 }
  0x2b   :  { %220 = vrot.lane.b32.xlu0 %v1520_v15, %s1372_s21 }
  0x2c   :  { %218 = vrot.lane.b32.xlu1 %v1526_v16, %s1372_s21 }
  0x30   :  { %222 = vrot.lane.b32.xlu1 %v1533_v17, %s1372_s21 }
  0x96   :  { %v58_v18 = vpop.xlane.xlu0 %57 }
  0x97   :  { %v61_v19 = vmul.f32 0.03125, %v58_v18 }
  0x98   :  { %v66_v20 = vpop.xlane.xlu1 %65 }
  0x99   :  { %v71_v21 = vmul.f32 %v61_v19, %v61_v19  ;;  %v69_v22 = vmul.f32 0.03125, %v66_v20  ;;  %v79_v32 = vsub.f32 %v1463_v0, %v61_v19 }
  0x9a   :  { %v60_v23 = vpop.xlane.xlu0 %59 }
  0x9b   :  { %v73_v24 = vsub.f32 %v69_v22, %v71_v21  ;;  %v62_v25 = vmul.f32 0.03125, %v60_v23 }
  0x9c   :  { %v68_v26 = vpop.xlane.xlu1 %67 }
  0x9d   :  { %v75_v27 = vadd.f32 1e-05, %v73_v24  ;;  %v72_v28 = vmul.f32 %v62_v25, %v62_v25  ;;  %v70_v29 = vmul.f32 0.03125, %v68_v26  ;;  %v80_v37 = vsub.f32 %v1468_v1, %v62_v25 }
  0x9e   :  { %v209_v47 = vpop.permute.xlu0 %208 }
  0x9f   :  { %1352 = vrsqrt.f32 %v75_v27  ;;  %v74_v30 = vsub.f32 %v70_v29, %v72_v28 }
  0xa0   :  { %v211_v44 = vpop.permute.xlu1 %210 }
  0xa1   :  { %v76_v31 = vadd.f32 1e-05, %v74_v30 }
  0xa2   :  { %v217_v49 = vpop.permute.xlu0 %216 }
  0xa3   :  { %1354 = vrsqrt.f32 %v76_v31 }
  0xa4   :  { %v213_v45 = vpop.permute.xlu1 %212 }
  0xa6   :  { %v221_v56 = vpop.permute.xlu0 %220 }
  0xa8   :  { %v215_v46 = vpop.permute.xlu1 %214 }
  0xa9   :  { %v1353_v33 = vpop.eup %1352 }
  0xaa   :  { %v81_v35 = vmul.f32 %v1353_v33, %v79_v32  ;;  %v396_v33 = vld [vmem:[%s1770_s15 + $0x8] sm:$0xff] }
  0xac   :  { %v89_v38 = vmul.f32 %v978_v34, %v81_v35  ;;  %v219_v48 = vpop.permute.xlu1 %218 }
  0xad   :  { %v1355_v39 = vpop.eup %1354 }
  0xae   :  { %v82_v40 = vmul.f32 %v1355_v39, %v80_v37  ;;  %v97_v41 = vadd.f32 %v979_v36, %v89_v38 }
  0xb0   :  { %v90_v42 = vmul.f32 %v978_v34, %v82_v40  ;;  %1080 = vmatprep.mubr.msk.f32.mxu0 %vm110_vm0, %v97_v41  ;;  %v223_v55 = vpop.permute.xlu1 %222 }
  0xb2   :  { %v98_v43 = vadd.f32 %v979_v36, %v90_v42  ;;  %v395_v36 = vld [vmem:[%s1770_s15] sm:$0xff] }
  0xb3   :  { %v412_v42 = vld [vmem:[%s1771_s14] sm:$0xff] }
  0xb4   :  { %1081 = vmatmul.mubr.msk.f32.vlgmr.msra.gmra.mrb[0].mxu0 %vm110_vm0, %v98_v43  ;;  %v413_v43 = vld [vmem:[%s1771_s14 + $0x8] sm:$0xff] }
 0x187   :  { %v1082_v51 = vpop.f32.mrb[0].mxu0 }
 0x188   :  { %v1549_v52 = vadd.f32 %v1082_v51, %v980_v50  ;;  %v183_v53 = vpop.f32.mrb[1].mxu0  ;;  %v419_v51 = vld [vmem:[%s1771_s14 + $0x38] sm:$0xff] }
 0x189   :  { %v1551_v54 = vadd.f32 %v980_v50, %v183_v53 }
 0x18a   :  { %v233_v57 = vmul.f32 %v211_v44, %v1549_v52  ;;  %v235_v58 = vmul.f32 %v215_v46, %v1549_v52  ;;  %v239_v61 = vmul.f32 %v223_v55, %v1549_v52  ;;  %v237_v62 = vmul.f32 %v219_v48, %v1549_v52  ;;  %v415_v46 = vld [vmem:[%s1771_s14 + $0x18] sm:$0xff]  ;;  %v416_v48 = vld [vmem:[%s1771_s14 + $0x20] sm:$0xff] }
 0x18b   :  { %1099 = vmatprep.mubr.msk.f32.mxu1 %vm110_vm0, %v1551_v54  ;;  %v232_v59 = vmul.f32 %v209_v47, %v1551_v54  ;;  %v234_v60 = vmul.f32 %v213_v45, %v1551_v54  ;;  %v238_v63 = vmul.f32 %v221_v56, %v1551_v54  ;;  %v236_v4 = vmul.f32 %v217_v49, %v1551_v54  ;;  %v414_v45 = vld [vmem:[%s1771_s14 + $0x10] sm:$0xff]  ;;  %v417_v49 = vld [vmem:[%s1771_s14 + $0x28] sm:$0xff] }
 0x18c   :  { %v1229_v44 = vpack.c.bf16 %v413_v43, %v412_v42  ;;  %v1233_v47 = vpack.c.bf16 %v415_v46, %v414_v45  ;;  %v1237_v50 = vpack.c.bf16 %v417_v49, %v416_v48 }
 0x18d   :  { %v1312_v2 = vpack.i.bf16 %v233_v57, %v232_v59  ;;  %v1317_v3 = vpack.i.bf16 %v235_v58, %v234_v60  ;;  %v1327_v5 = vpack.i.bf16 %v239_v61, %v238_v63  ;;  %v1322_v6 = vpack.i.bf16 %v237_v62, %v236_v4 }
 0x18e   :  { %1230 = vmatprep.subr.bf16.mxu0 %v1229_v44 }
 0x18f   :  { %1313 = vrot.lane.b32.xlu0 %v1312_v2, %s1373_s4  ;;  %1318 = vrot.lane.b32.xlu1 %v1317_v3, %s1373_s4 }
 0x190   :  { %1232 = vmatpush3.bf16.msra.mxu0 %v1229_v44 }
 0x191   :  { %1234 = vmatprep.subr.bf16.mxu0 %v1233_v47 }
 0x193   :  { %1323 = vrot.lane.b32.xlu0 %v1322_v6, %s1373_s4  ;;  %1328 = vrot.lane.b32.xlu1 %v1327_v5, %s1373_s4 }
 0x194   :  { %1236 = vmatpush3.bf16.msra.mxu0 %v1233_v47 }
 0x195   :  { %1238 = vmatprep.subr.bf16.mxu0 %v1237_v50 }
 0x198   :  { %1240 = vmatpush3.bf16.msra.mxu0 %v1237_v50 }
 0x201   :  { %v1314_v7 = vpop.permute.xlu0 %1313  ;;  %v1319_v8 = vpop.permute.xlu1 %1318 }
 0x202   :  { %v1316_v9 = vunpack.i.h.bf16 %v1314_v7  ;;  %v1315_v18 = vunpack.i.l.bf16 %v1314_v7  ;;  %v1321_v19 = vunpack.i.h.bf16 %v1319_v8  ;;  %v1320_v20 = vunpack.i.l.bf16 %v1319_v8 }
 0x204   :  { %v1205_v22 = vpack.c.bf16 %v1316_v9, %v1315_v18  ;;  %v1211_v23 = vpack.c.bf16 %v1321_v19, %v1320_v20 }
 0x205   :  { %v1324_v24 = vpop.permute.xlu0 %1323  ;;  %v1329_v28 = vpop.permute.xlu1 %1328 }
 0x206   :  { %1207 = vmatprep.subr.msk.bf16.mxu1 %vm1565_vm1, %v1205_v22  ;;  %v1326_v25 = vunpack.i.h.bf16 %v1324_v24  ;;  %v1325_v26 = vunpack.i.l.bf16 %v1324_v24  ;;  %v1331_v29 = vunpack.i.h.bf16 %v1329_v28  ;;  %v1330_v30 = vunpack.i.l.bf16 %v1329_v28 }
 0x207   :  { %1210 = vmatpush3.bf16.xpose.msk.msra.mxu1 %vm1565_vm1, %v1205_v22 }
 0x208   :  { %1213 = vmatprep.subr.msk.bf16.mxu1 %vm1565_vm1, %v1211_v23  ;;  %v1217_v27 = vpack.c.bf16 %v1326_v25, %v1325_v26  ;;  %v1223_v31 = vpack.c.bf16 %v1331_v29, %v1330_v30 }
 0x20f   :  { %1216 = vmatpush3.bf16.xpose.msk.msra.mxu1 %vm1565_vm1, %v1211_v23 }
 0x210   :  { %1219 = vmatprep.subr.msk.bf16.mxu1 %vm1565_vm1, %v1217_v27 }
 0x217   :  { %1222 = vmatpush3.bf16.xpose.msk.msra.mxu1 %vm1565_vm1, %v1217_v27 }
 0x218   :  { %1225 = vmatprep.subr.msk.bf16.mxu1 %vm1565_vm1, %v1223_v31 }
 0x21f   :  { %1228 = vmatpush3.bf16.xpose.msk.msra.mxu1 %vm1565_vm1, %v1223_v31 }
 0x226   :  { %1100 = vmatmul.mubr.msk.f32.vlgmr.msra.gmra.mrb[0].mxu1 %vm110_vm0, %v1549_v52 }
 0x2f9   :  { %v1101_v32 = vpop.f32.mrb[0].mxu1 }
 0x2fa   :  { %v394_v34 = vmul.f32 0.35355338, %v1101_v32  ;;  %v384_v35 = vpop.f32.mrb[1].mxu1 }
 0x2fb   :  { %v393_v37 = vmul.f32 0.35355338, %v384_v35 }
 0x2fc   :  { %v398_v38 = vadd.f32 %v396_v33, %v394_v34  ;;  %v624_v33 = vld [vmem:[%s1772_s5] sm:$0xff]  ;;  %v625_v34 = vld [vmem:[%s1772_s5 + $0x8] sm:$0xff] }
 0x2fd   :  { %v397_v39 = vadd.f32 %v395_v36, %v393_v37 }
 0x2fe   :  { %v403_v40 = vsel %vm399_vm2, %v398_v38, -inf }
 0x2ff   :  { %404 = vmax.xlane.f32.xlu1 %v403_v40  ;;  %v400_v41 = vsel %vm399_vm2, %v397_v39, -inf }
 0x300   :  { %401 = vmax.xlane.f32.xlu0 %v400_v41 }
 0x310   :  { %242 = vrot.lane.b32.xlu1 %v1491_v10, %s1374_s18  ;;  %v418_v10 = vld [vmem:[%s1771_s14 + $0x30] sm:$0xff] }
 0x311   :  { %v1241_v53 = vpack.c.bf16 %v419_v51, %v418_v10  ;;  %v626_v10 = vld [vmem:[%s1772_s5 + $0x10] sm:$0xff]  ;;  %v627_v51 = vld [vmem:[%s1772_s5 + $0x18] sm:$0xff] }
 0x313   :  { %1242 = vmatprep.subr.bf16.mxu0 %v1241_v53 }
 0x314   :  { %246 = vrot.lane.b32.xlu1 %v1514_v14, %s1374_s18  ;;  %1244 = vmatpush3.bf16.msra.mxu0 %v1241_v53 }
 0x316   :  { %240 = vrot.lane.b32.xlu0 %v1497_v11, %s1374_s18 }
 0x318   :  { %250 = vrot.lane.b32.xlu1 %v1526_v16, %s1374_s18 }
 0x31a   :  { %244 = vrot.lane.b32.xlu0 %v1502_v12, %s1374_s18 }
 0x31c   :  { %254 = vrot.lane.b32.xlu1 %v1533_v17, %s1374_s18 }
 0x31e   :  { %248 = vrot.lane.b32.xlu0 %v1508_v13, %s1374_s18 }
 0x322   :  { %252 = vrot.lane.b32.xlu0 %v1520_v15, %s1374_s18 }
 0x38c   :  { %v405_v11 = vpop.xlane.xlu1 %404 }
 0x38d   :  { %v407_v14 = vsub.f32 %v398_v38, %v405_v11  ;;  %v402_v55 = vpop.xlane.xlu0 %401  ;;  %v1261_v38 = vpack.c.bf16 %v625_v34, %v624_v33 }
 0x38e   :  { %v406_v56 = vsub.f32 %v397_v39, %v402_v55 }
 0x38f   :  { %v410_v16 = vmul.f32 1.442695, %v407_v14  ;;  %v1265_v14 = vpack.c.bf16 %v627_v51, %v626_v10  ;;  %v883_v10 = vld [vmem:[%s1775_s11 + $0x58] sm:$0xff] }
 0x390   :  { %v408_v57 = vmul.f32 1.442695, %v406_v56  ;;  %v243_v58 = vpop.permute.xlu1 %242 }
 0x391   :  { %v265_v12 = vmul.f32 %v243_v58, %v1549_v52  ;;  %v241_v59 = vpop.permute.xlu0 %240 }
 0x392   :  { %1356 = vpow2.f32 %v408_v57  ;;  %v264_v60 = vmul.f32 %v241_v59, %v1551_v54 }
 0x393   :  { %1358 = vpow2.f32 %v410_v16  ;;  %v997_v16 = vld [vmem:[%s1773_s6] ss:$0 sm:$0xff] }
 0x394   :  { %v1332_v17 = vpack.i.bf16 %v265_v12, %v264_v60  ;;  %v247_v61 = vpop.permute.xlu1 %246 }
 0x395   :  { %v267_v13 = vmul.f32 %v247_v61, %v1549_v52  ;;  %v245_v62 = vpop.permute.xlu0 %244 }
 0x396   :  { %v266_v15 = vmul.f32 %v245_v62, %v1551_v54  ;;  %1333 = vrot.lane.b32.xlu0 %v1332_v17, %s1374_s18  ;;  %v764_v62 = vld [vmem:[%s1774_s9 + $0x10] sm:$0xff] }
 0x398   :  { %v1337_v63 = vpack.i.bf16 %v267_v13, %v266_v15  ;;  %v251_v2 = vpop.permute.xlu1 %250 }
 0x399   :  { %v269_v3 = vmul.f32 %v251_v2, %v1549_v52  ;;  %v249_v4 = vpop.permute.xlu0 %248 }
 0x39a   :  { %v268_v5 = vmul.f32 %v249_v4, %v1551_v54  ;;  %1338 = vrot.lane.b32.xlu1 %v1337_v63, %s1374_s18  ;;  %v765_v63 = vld [vmem:[%s1774_s9 + $0x18] sm:$0xff]  ;;  %v873_v4 = vld [vmem:[%s1775_s11 + $0x8] sm:$0xff] }
 0x39b   :  { %v1273_v2 = vpack.c.bf16 %v765_v63, %v764_v62 }
 0x39c   :  { %v1357_v6 = vpop.eup %1356  ;;  %v1342_v7 = vpack.i.bf16 %v269_v3, %v268_v5  ;;  %v255_v8 = vpop.permute.xlu1 %254  ;;  %v872_v3 = vld [vmem:[%s1775_s11] sm:$0xff] }
 0x39d   :  { %v1359_v9 = vpop.eup %1358  ;;  %v271_v18 = vmul.f32 %v255_v8, %v1549_v52  ;;  %1118 = vmatprep.mubr.msk.f32.mxu0 %vm399_vm2, %v1357_v6  ;;  %v253_v19 = vpop.permute.xlu0 %252  ;;  %v1277_v5 = vpack.c.bf16 %v873_v4, %v872_v3 }
 0x39e   :  { %v270_v20 = vmul.f32 %v253_v19, %v1551_v54  ;;  %1119 = vmatmul.mubr.msk.f32.vlgmr.msra.gmra.mrb[2].mxu0 %vm399_vm2, %v1359_v9  ;;  %1343 = vrot.lane.b32.xlu0 %v1342_v7, %s1374_s18 }
 0x39f   :  { %1278 = vmatprep.subr.bf16.mxu1 %v1277_v5 }
 0x3a0   :  { %v1347_v21 = vpack.i.bf16 %v271_v18, %v270_v20  ;;  %1280 = vmatpush3.bf16.msra.mxu1 %v1277_v5 }
 0x3a2   :  { %1348 = vrot.lane.b32.xlu1 %v1347_v21, %s1374_s18 }
 0x408   :  { %v1334_v22 = vpop.permute.xlu0 %1333 }
 0x409   :  { %v1336_v23 = vunpack.i.h.bf16 %v1334_v22  ;;  %v1335_v24 = vunpack.i.l.bf16 %v1334_v22 }
 0x40b   :  { %v1245_v25 = vpack.c.bf16 %v1336_v23, %v1335_v24 }
 0x40c   :  { %v1339_v26 = vpop.permute.xlu1 %1338 }
 0x40d   :  { %v1341_v27 = vunpack.i.h.bf16 %v1339_v26  ;;  %v1340_v28 = vunpack.i.l.bf16 %v1339_v26  ;;  %1246 = vmatprep.subr.bf16.mxu0 %v1245_v25 }
 0x40e   :  { %1248 = vmatpush3.bf16.msra.mxu0 %v1245_v25 }
 0x40f   :  { %v1249_v52 = vpack.c.bf16 %v1341_v27, %v1340_v28 }
 0x410   :  { %v1344_v29 = vpop.permute.xlu0 %1343 }
 0x411   :  { %v1346_v30 = vunpack.i.h.bf16 %v1344_v29  ;;  %v1345_v54 = vunpack.i.l.bf16 %v1344_v29  ;;  %1250 = vmatprep.subr.bf16.mxu0 %v1249_v52  ;;  %v1000_v29 = vld [vmem:[%s1776_s7] ss:$0 sm:$0xff] }
 0x412   :  { %1252 = vmatpush3.bf16.msra.mxu0 %v1249_v52 }
 0x413   :  { %v1253_v31 = vpack.c.bf16 %v1346_v30, %v1345_v54  ;;  %v1001_v54 = vld [vmem:[%s1777_s8] ss:$0 sm:$0xff] }
 0x414   :  { %v1349_v32 = vpop.permute.xlu1 %1348 }
 0x415   :  { %v1351_v35 = vunpack.i.h.bf16 %v1349_v32  ;;  %v1350_v36 = vunpack.i.l.bf16 %v1349_v32  ;;  %1254 = vmatprep.subr.bf16.mxu0 %v1253_v31 }
 0x416   :  { %1256 = vmatpush3.bf16.msra.mxu0 %v1253_v31 }
 0x417   :  { %v1257_v37 = vpack.c.bf16 %v1351_v35, %v1350_v36 }
 0x419   :  { %1258 = vmatprep.subr.bf16.mxu0 %v1257_v37 }
 0x41a   :  { %1260 = vmatpush3.bf16.msra.mxu0 %v1257_v37 }
 0x41b   :  { %1262 = vmatprep.subr.bf16.mxu0 %v1261_v38 }
 0x471   :  { %v1120_v39 = vpop.f32.mrb[2].mxu0 }
 0x472   :  { %v498_v40 = vadd.f32 1e-30, %v1120_v39  ;;  %v492_v41 = vpop.f32.mrb[3].mxu0  ;;  %v875_v39 = vld [vmem:[%s1775_s11 + $0x18] sm:$0xff] }
 0x473   :  { %v493_v42 = vadd.f32 1e-30, %v492_v41  ;;  %v876_v41 = vld [vmem:[%s1775_s11 + $0x20] sm:$0xff] }
 0x474   :  { %1360 = vrcp.f32 %v498_v40 }
 0x475   :  { %1362 = vrcp.f32 %v493_v42 }
 0x47e   :  { %v1361_v43 = vpop.eup %1360 }
 0x47f   :  { %v1363_v44 = vpop.eup %1362  ;;  %v504_v45 = vmul.f32 %v1361_v43, %v498_v40 }
 0x480   :  { %v503_v46 = vmul.f32 %v1363_v44, %v493_v42  ;;  %v877_v42 = vld [vmem:[%s1775_s11 + $0x28] sm:$0xff] }
 0x481   :  { %v506_v47 = vsub.f32 2.0, %v504_v45  ;;  %v879_v45 = vld [vmem:[%s1775_s11 + $0x38] sm:$0xff] }
 0x482   :  { %v505_v48 = vsub.f32 2.0, %v503_v46 }
 0x483   :  { %v508_v49 = vmul.f32 %v1361_v43, %v506_v47  ;;  %v1285_v43 = vpack.c.bf16 %v877_v42, %v876_v41  ;;  %v880_v47 = vld [vmem:[%s1775_s11 + $0x40] sm:$0xff] }
 0x484   :  { %v507_v50 = vmul.f32 %v1363_v44, %v505_v48  ;;  %v878_v44 = vld [vmem:[%s1775_s11 + $0x30] sm:$0xff]  ;;  %v881_v48 = vld [vmem:[%s1775_s11 + $0x48] sm:$0xff] }
 0x485   :  { %v510_v11 = vmul.f32 %v1359_v9, %v508_v49  ;;  %v1289_v46 = vpack.c.bf16 %v879_v45, %v878_v44  ;;  %v882_v49 = vld [vmem:[%s1775_s11 + $0x50] sm:$0xff] }
 0x486   :  { %v509_v53 = vmul.f32 %v1357_v6, %v507_v50  ;;  %v1293_v50 = vpack.c.bf16 %v881_v48, %v880_v47  ;;  %v1297_v51 = vpack.c.bf16 %v883_v10, %v882_v49 }
 0x488   :  { %1137 = vmatprep.mubr.msk.f32.mxu0 %vm399_vm2, %v509_v53  ;;  %v884_v53 = vld [vmem:[%s1775_s11 + $0x60] sm:$0xff] }
 0x489   :  { %1138 = vmatmul.mubr.msk.f32.vlgmr.msra.gmra.mrb[4].mxu0 %vm399_vm2, %v510_v11  ;;  %v885_v11 = vld [vmem:[%s1775_s11 + $0x68] sm:$0xff] }
 0x48a   :  { %1264 = vmatpush3.bf16.msra.mxu0 %v1261_v38  ;;  %v874_v38 = vld [vmem:[%s1775_s11 + $0x10] sm:$0xff] }
 0x48b   :  { %1266 = vmatprep.subr.bf16.mxu0 %v1265_v14  ;;  %v1281_v40 = vpack.c.bf16 %v875_v39, %v874_v38 }
 0x48d   :  { %1282 = vmatprep.subr.bf16.mxu1 %v1281_v40 }
 0x48e   :  { %1268 = vmatpush3.bf16.msra.mxu0 %v1265_v14  ;;  %1284 = vmatpush3.bf16.msra.mxu1 %v1281_v40  ;;  %v1301_v14 = vpack.c.bf16 %v885_v11, %v884_v53 }
 0x48f   :  { %1286 = vmatprep.subr.bf16.mxu1 %v1285_v43 }
 0x492   :  { %1288 = vmatpush3.bf16.msra.mxu1 %v1285_v43 }
 0x493   :  { %1290 = vmatprep.subr.bf16.mxu1 %v1289_v46 }
 0x496   :  { %1292 = vmatpush3.bf16.msra.mxu1 %v1289_v46 }
 0x497   :  { %1294 = vmatprep.subr.bf16.mxu1 %v1293_v50 }
 0x49a   :  { %1296 = vmatpush3.bf16.msra.mxu1 %v1293_v50 }
 0x49b   :  { %1298 = vmatprep.subr.bf16.mxu1 %v1297_v51 }
 0x49e   :  { %1300 = vmatpush3.bf16.msra.mxu1 %v1297_v51 }
 0x49f   :  { %1302 = vmatprep.subr.bf16.mxu1 %v1301_v14 }
 0x4a2   :  { %1304 = vmatpush3.bf16.msra.mxu1 %v1301_v14 }
 0x55c   :  { %v1139_v55 = vpop.f32.mrb[4].mxu0 }
 0x55d   :  { %v615_v56 = vpop.f32.mrb[5].mxu0 }
 0x55e   :  { %1148 = vmatprep.mubr.msk.f32.mxu0 %vm110_vm0, %v615_v56  ;;  %v887_v56 = vld [vmem:[%s1775_s11 + $0x78] sm:$0xff] }
 0x55f   :  { %1149 = vmatmul.mubr.msk.f32.vlgmr.msra.gmra.mrb[6].mxu0 %vm110_vm0, %v1139_v55  ;;  %v886_v55 = vld [vmem:[%s1775_s11 + $0x70] sm:$0xff] }
 0x632   :  { %v1150_v57 = vpop.f32.mrb[6].mxu0 }
 0x633   :  { %v713_v58 = vadd.f32 %v1150_v57, %v997_v16  ;;  %v707_v12 = vpop.f32.mrb[7].mxu0  ;;  %v1002_v57 = vld [vmem:[%s1778_s10] ss:$0 sm:$0xff] }
 0x634   :  { %v708_v59 = vadd.f32 %v997_v16, %v707_v12  ;;  %v1305_v16 = vpack.c.bf16 %v887_v56, %v886_v55 }
 0x635   :  { %v1669_v60 = vadd.f32 %v713_v58, %v1468_v1  ;;  %v762_v1 = vld [vmem:[%s1774_s9] sm:$0xff] }
 0x636   :  { %v1672_v17 = vadd.f32 %v708_v59, %v1463_v0  ;;  %v763_v0 = vld [vmem:[%s1774_s9 + $0x8] sm:$0xff]  ;;  %1306 = vmatprep.subr.bf16.mxu1 %v1305_v16 }
 0x637   :  { %722 = vadd.xlane.f32.xlu1 %v1669_v60  ;;  %v727_v13 = vmul.f32 %v1669_v60, %v1669_v60  ;;  %v1269_v15 = vpack.c.bf16 %v763_v0, %v762_v1  ;;  %1308 = vmatpush3.bf16.msra.mxu1 %v1305_v16 }
 0x638   :  { %720 = vadd.xlane.f32.xlu0 %v1672_v17  ;;  %v726_v61 = vmul.f32 %v1672_v17, %v1672_v17 }
 0x639   :  { %1270 = vmatprep.subr.bf16.mxu0 %v1269_v15 }
 0x63a   :  { %1272 = vmatpush3.bf16.msra.mxu0 %v1269_v15 }
 0x63b   :  { %1274 = vmatprep.subr.bf16.mxu0 %v1273_v2 }
 0x63c   :  { %728 = vadd.xlane.f32.xlu0 %v726_v61 }
 0x63e   :  { %1276 = vmatpush3.bf16.msra.mxu0 %v1273_v2 }
 0x640   :  { %730 = vadd.xlane.f32.xlu0 %v727_v13 }
 0x6c4   :  { %v723_v8 = vpop.xlane.xlu1 %722 }
 0x6c5   :  { %v721_v6 = vpop.xlane.xlu0 %720  ;;  %v725_v18 = vmul.f32 0.03125, %v723_v8 }
 0x6c6   :  { %v724_v7 = vmul.f32 0.03125, %v721_v6 }
 0x6c7   :  { %v735_v23 = vmul.f32 %v725_v18, %v725_v18  ;;  %v743_v31 = vsub.f32 %v1669_v60, %v725_v18 }
 0x6c8   :  { %v734_v19 = vmul.f32 %v724_v7, %v724_v7  ;;  %v742_v28 = vsub.f32 %v1672_v17, %v724_v7 }
 0x6c9   :  { %v729_v9 = vpop.xlane.xlu0 %728 }
 0x6ca   :  { %v732_v20 = vmul.f32 0.03125, %v729_v9 }
 0x6cc   :  { %v736_v21 = vsub.f32 %v732_v20, %v734_v19 }
 0x6cd   :  { %v731_v22 = vpop.xlane.xlu0 %730 }
 0x6ce   :  { %v738_v24 = vadd.f32 1e-05, %v736_v21  ;;  %v733_v25 = vmul.f32 0.03125, %v731_v22  ;;  %v1005_v22 = vld [vmem:[%s1779_s12] ss:$0 sm:$0xff] }
 0x6d0   :  { %1364 = vrsqrt.f32 %v738_v24  ;;  %v737_v26 = vsub.f32 %v733_v25, %v735_v23 }
 0x6d2   :  { %v739_v27 = vadd.f32 1e-05, %v737_v26 }
 0x6d4   :  { %1366 = vrsqrt.f32 %v739_v27 }
 0x6da   :  { %v1365_v52 = vpop.eup %1364 }
 0x6db   :  { %v744_v30 = vmul.f32 %v1365_v52, %v742_v28 }
 0x6dd   :  { %v752_v32 = vmul.f32 %v1000_v29, %v744_v30 }
 0x6de   :  { %v1367_v33 = vpop.eup %1366 }
 0x6df   :  { %v745_v34 = vmul.f32 %v1367_v33, %v743_v31  ;;  %v760_v35 = vadd.f32 %v1001_v54, %v752_v32 }
 0x6e1   :  { %v753_v36 = vmul.f32 %v1000_v29, %v745_v34  ;;  %1159 = vmatprep.mubr.msk.f32.mxu0 %vm110_vm0, %v760_v35 }
 0x6e3   :  { %v761_v37 = vadd.f32 %v1001_v54, %v753_v36 }
 0x6e5   :  { %1160 = vmatmul.mubr.msk.f32.vlgmr.msra.gmra.mrb[8].mxu0 %vm110_vm0, %v761_v37 }
 0x7b8   :  { %v1161_v58 = vpop.f32.mrb[8].mxu0 }
 0x7b9   :  { %v851_v12 = vadd.f32 %v1161_v58, %v1002_v57  ;;  %v845_v59 = vpop.f32.mrb[9].mxu0 }
 0x7ba   :  { %v846_v61 = vadd.f32 %v1002_v57, %v845_v59 }
 0x7bb   :  { %v857_v13 = vmul.f32 0.044715, %v851_v12  ;;  %v855_v19 = vmul.f32 0.5, %v851_v12 }
 0x7bc   :  { %v856_v1 = vmul.f32 0.044715, %v846_v61  ;;  %v854_v9 = vmul.f32 0.5, %v846_v61 }
 0x7bd   :  { %v859_v0 = vmul.f32 %v857_v13, %v851_v12 }
 0x7be   :  { %v858_v62 = vmul.f32 %v856_v1, %v846_v61 }
 0x7bf   :  { %v861_v15 = vmul.f32 %v859_v0, %v851_v12 }
 0x7c0   :  { %v860_v63 = vmul.f32 %v858_v62, %v846_v61 }
 0x7c1   :  { %v863_v2 = vadd.f32 %v861_v15, %v851_v12 }
 0x7c2   :  { %v862_v3 = vadd.f32 %v860_v63, %v846_v61 }
 0x7c3   :  { %v865_v4 = vmul.f32 0.7978846, %v863_v2 }
 0x7c4   :  { %v864_v5 = vmul.f32 0.7978846, %v862_v3 }
 0x7c5   :  { %1368 = vtanh.f32 %v865_v4 }
 0x7c6   :  { %1370 = vtanh.f32 %v864_v5 }
 0x7cf   :  { %v1369_v6 = vpop.eup %1368 }
 0x7d0   :  { %v1371_v7 = vpop.eup %1370  ;;  %v869_v8 = vadd.f32 1.0, %v1369_v6 }
 0x7d1   :  { %v868_v18 = vadd.f32 1.0, %v1371_v7 }
 0x7d2   :  { %v871_v21 = vmul.f32 %v869_v8, %v855_v19 }
 0x7d3   :  { %v870_v20 = vmul.f32 %v868_v18, %v854_v9 }
 0x7d5   :  { %1194 = vmatprep.mubr.f32.mxu1 %v870_v20 }
 0x7d6   :  { %1195 = vmatmul.mubr.f32.vlgmr.msra.gmra.mrb[2].mxu1 %v871_v21 }
 0x8a9   :  { %v1196_v23 = vpop.f32.mrb[2].mxu1 }
 0x8aa   :  { %v967_v24 = vadd.f32 %v1196_v23, %v1005_v22  ;;  %v961_v25 = vpop.f32.mrb[3].mxu1 }
 0x8ab   :  { %v962_v26 = vadd.f32 %v1005_v22, %v961_v25 }
 0x8ac   :  { %v971_v27 = vadd.f32 %v967_v24, %v1669_v60 }
 0x8ad   :  { %v970_v28 = vadd.f32 %v962_v26, %v1672_v17 }
 0x8ae   :  { %973 = vst [vmem:[%s1780_s16 + $0x8] sm:$0xff] %v971_v27 }
 0x8af   :  { %972 = vst [vmem:[%s1780_s16] sm:$0xff] %v970_v28 }

</bundles_post_ra>
